<compile_context>
chip_gen: v7x
topology: tpu7x:2x2x1
jax: 0.10.0
libtpu: 0.0.40
codegen_flags: <defaults>
</compile_context>

<pallas_src>
import math

import jax
import jax.numpy as jnp
from jax.experimental import pallas as pl
from jax.experimental.pallas import tpu as pltpu

# Lane widths tried for the lane-dense reinterpretation (largest first).
_LANE_CANDIDATES = (4096, 2048, 1024, 512, 256, 128)

# Below this many bytes the fixed launch/grid overhead dwarfs the copy; the
# identity semantics make a plain `return x` exactly equivalent.
_MIN_KERNEL_BYTES = 64 * 1024

# Keep at least this many grid steps (when possible) so the "parallel" grid
# axis can be sharded across both TensorCores on v7x.  Measured no-op on
# single-TC chips; costs only a few extra ~0.35 us steps there.
_MIN_GRID_STEPS = 8

# Conservative fallbacks if the hardware query is unavailable.
_DEFAULT_BLOCK_BYTES = 2 * 1024 * 1024
_DEFAULT_VMEM_LIMIT = 32 * 1024 * 1024


def _tuning():
    """(target_block_bytes, vmem_limit_bytes) tuned per TPU generation."""
    target, limit = _DEFAULT_BLOCK_BYTES, _DEFAULT_VMEM_LIMIT
    try:
        cap = getattr(pltpu.get_tpu_info(), "vmem_capacity_bytes", None)
        if cap is not None:
            if cap <= 80 * 1024 * 1024:
                # v7x-class: 64 MiB VMEM per TC, ~3.2 TB/s.  6 MiB blocks cut
                # the per-step overhead to <7%; 4 double-buffered buffers =
                # 24 MiB, under the raised 48 MiB scoped limit.
                target, limit = 6 * 1024 * 1024, 48 * 1024 * 1024
            else:
                # v5e/v6e-class: 128 MiB VMEM — 4 MiB blocks are free headroom.
                target, limit = 4 * 1024 * 1024, 64 * 1024 * 1024
    except Exception:
        pass
    return target, limit


def _identity_kernel(x_ref, o_ref):
    # Pure pass-through of the current tile (vld -> vst; entirely DMA bound).
    o_ref[...] = x_ref[...]


def _pack_factor(dtype) -> int:
    """Sublane pack factor: 8 rows/vreg for 32-bit, 16 for 16-bit, 32 for 8-bit."""
    itemsize = jnp.dtype(dtype).itemsize
    return max(8, 8 * (4 // max(1, itemsize)))


def _copy_2d(x2, *, target_block_bytes, vmem_limit_bytes, donate):
    """Tiled identity copy of a lane-dense 2-D view (rows, cols)."""
    rows, cols = x2.shape
    itemsize = jnp.dtype(x2.dtype).itemsize
    pack = _pack_factor(x2.dtype)

    # Rows per block from the byte budget, capped so the grid keeps at least
    # _MIN_GRID_STEPS steps, rounded down to the dtype's sublane pack factor.
    budget_rows = max(1, target_block_bytes // max(1, cols * itemsize))
    split_rows = -(-rows // _MIN_GRID_STEPS)
    row_tile = min(budget_rows, split_rows)
    row_tile = max(pack, (row_tile // pack) * pack)
    if row_tile >= rows:
        # Single block spanning every row; full-extent dims are always legal.
        row_tile = rows

    grid = (pl.cdiv(rows, row_tile),)  # partial tail block is masked by Pallas

    return pl.pallas_call(
        _identity_kernel,
        out_shape=jax.ShapeDtypeStruct((rows, cols), x2.dtype),
        grid_spec=pltpu.PrefetchScalarGridSpec(
            num_scalar_prefetch=0,
            grid=grid,
            in_specs=[pl.BlockSpec((row_tile, cols), lambda i: (i, 0))],
            out_specs=pl.BlockSpec((row_tile, cols), lambda i: (i, 0)),
        ),
        compiler_params=pltpu.CompilerParams(
            dimension_semantics=("parallel",),
            vmem_limit_bytes=vmem_limit_bytes,
        ),
        cost_estimate=pl.CostEstimate(
            flops=0, transcendentals=0,
            bytes_accessed=2 * rows * cols * itemsize),
        # Output may only alias the input when the caller actually donates it;
        # otherwise XLA adds a defensive full copy (doubles HBM traffic).
        input_output_aliases=({0: 0} if donate else {}),
    )(x2)


def _copy_lane_blocks(x1n, *, target_block_bytes, vmem_limit_bytes, donate):
    """Identity copy of a (1, N) view in full-128-lane blocks (any N)."""
    _, n = x1n.shape
    itemsize = jnp.dtype(x1n.dtype).itemsize

    # A (1, X) tile still occupies whole (sublane-pack, 128) VMEM tiles, i.e.
    # ~32 bytes/element regardless of dtype — size the lane tile for that so
    # 4 double-buffered buffers stay far below the scoped VMEM limit.
    lane_tile = max(128, ((target_block_bytes // 32) // 128) * 128)
    if lane_tile >= n:
        lane_tile = n  # single full-extent block: legal for any N

    grid = (pl.cdiv(n, lane_tile),)  # partial tail block is masked by Pallas

    return pl.pallas_call(
        _identity_kernel,
        out_shape=jax.ShapeDtypeStruct((1, n), x1n.dtype),
        grid_spec=pltpu.PrefetchScalarGridSpec(
            num_scalar_prefetch=0,
            grid=grid,
            in_specs=[pl.BlockSpec((1, lane_tile), lambda i: (0, i))],
            out_specs=pl.BlockSpec((1, lane_tile), lambda i: (0, i)),
        ),
        compiler_params=pltpu.CompilerParams(
            dimension_semantics=("parallel",),
            vmem_limit_bytes=vmem_limit_bytes,
        ),
        cost_estimate=pl.CostEstimate(
            flops=0, transcendentals=0, bytes_accessed=2 * n * itemsize),
        input_output_aliases=({0: 0} if donate else {}),
    )(x1n)


def identity_projection(
    x: jnp.ndarray,
    *,
    target_block_bytes: int | None = None,
    vmem_limit_bytes: int | None = None,
    min_kernel_bytes: int = _MIN_KERNEL_BYTES,
    donate: bool = False,
) -> jnp.ndarray:
    """Pallas implementation of IdentityProjection.forward (y = x).

    Accepts any shape (*, H); returns an array of identical shape/dtype.
    Set `donate=True` only if the caller donates `x` (enables output aliasing).
    """
    orig_shape = x.shape
    total = math.prod(orig_shape) if orig_shape else 1
    itemsize = jnp.dtype(x.dtype).itemsize

    if total == 0 or total * itemsize < min_kernel_bytes:
        # Nothing to move / launch overhead would dominate: identity is exact.
        return x

    tuned_block, tuned_limit = _tuning()
    if target_block_bytes is None:
        target_block_bytes = tuned_block
    if vmem_limit_bytes is None:
        vmem_limit_bytes = tuned_limit

    if total % 128 == 0:
        # Lane-dense path: reinterpret the flat element stream as (rows, cols)
        # with cols a large multiple of 128 so every store is a full-lane vst,
        # independent of the model's hidden dim (e.g. dim=32).
        cols = next(c for c in _LANE_CANDIDATES if total % c == 0)
        rows = total // cols
        out = _copy_2d(
            x.reshape(rows, cols),
            target_block_bytes=target_block_bytes,
            vmem_limit_bytes=vmem_limit_bytes,
            donate=donate,
        )
    else:
        # Ragged total: view as (1, N) and copy in full-128-lane blocks; only
        # the final partial block uses masked stores (<lane_tile elements).
        out = _copy_lane_blocks(
            x.reshape(1, total),
            target_block_bytes=target_block_bytes,
            vmem_limit_bytes=vmem_limit_bytes,
            donate=donate,
        )
    return out.reshape(orig_shape)


if __name__ == "__main__":
    key = jax.random.PRNGKey(0)

    # Canonical module usage: IdentityProjection(dim=32) on (batch=2, seq=8, hidden=32).
    dim = 32
    x = jax.random.normal(key, (2, 8, dim), dtype=jnp.float32)

    # Default path: tiny input -> zero-cost early return (exact module semantics).
    y = jax.block_until_ready(identity_projection(x))
    assert y.shape == x.shape and y.dtype == x.dtype, (y.shape, y.dtype)
    assert bool(jnp.array_equal(y, x)), "identity mismatch (bypass path)"

    # Force the Pallas kernel on the canonical small shape (lane-dense path).
    y_k = jax.block_until_ready(identity_projection(x, min_kernel_bytes=0))
    assert bool(jnp.array_equal(y_k, x)), "identity mismatch (lane-dense, small)"

    # bf16, multi-block grid with a masked partial tail row block (pack=16).
    x2 = jax.random.normal(jax.random.PRNGKey(1), (176, 640), dtype=jnp.bfloat16)
    y2 = jax.block_until_ready(identity_projection(x2, target_block_bytes=65536))
    assert bool(jnp.array_equal(y2, x2)), "identity mismatch (bf16 multi-block)"

    # Element count not divisible by 128 -> lane-blocked (1, N) ragged path.
    x3 = jax.random.normal(jax.random.PRNGKey(2), (3, 7, 20), dtype=jnp.float32)
    y3 = jax.block_until_ready(identity_projection(x3, min_kernel_bytes=0))
    assert bool(jnp.array_equal(y3, x3)), "identity mismatch (ragged single block)"

    # Ragged + multi-step grid with a masked partial lane tail block.
    x4 = jax.random.normal(jax.random.PRNGKey(3), (129, 257), dtype=jnp.float32)
    y4 = jax.block_until_ready(
        identity_projection(x4, target_block_bytes=65536, min_kernel_bytes=0))
    assert bool(jnp.array_equal(y4, x4)), "identity mismatch (ragged multi-block)"

    print("KERNEL_OK")
</pallas_src>

<mosaic_0001>
module attributes {stable_mosaic.version = 11 : i64} {
  func.func @_identity_kernel(%arg0: i32, %arg1: memref<1x512xf32, #tpu.memory_space<vmem>>, %arg2: memref<1x512xf32, #tpu.memory_space<vmem>>) attributes {dimension_semantics = [#tpu.dimension_semantics<parallel>], iteration_bounds = array<i64: 1>, scalar_prefetch = 0 : i64, scratch_operands = 0 : i64, tpu.core_type = #tpu.core_type<tc>, window_params = [{transform_indices = @transform_0, window_bounds = array<i64: 1, 512>}, {transform_indices = @transform_1, window_bounds = array<i64: 1, 512>}]} {
    %c0 = arith.constant 0 : index
    %c0_0 = arith.constant 0 : index
    %0 = vector.load %arg1[%c0, %c0_0] : memref<1x512xf32, #tpu.memory_space<vmem>>, vector<1x512xf32>
    %c0_1 = arith.constant 0 : index
    %c0_2 = arith.constant 0 : index
    %1 = vector.load %arg2[%c0_1, %c0_2] : memref<1x512xf32, #tpu.memory_space<vmem>>, vector<1x512xf32>
    tpu.vector_store %arg2[%c0_1, %c0_2], %0 {strides = array<i32>} : memref<1x512xf32, #tpu.memory_space<vmem>>, vector<1x512xf32>,
    return
  }
  func.func @transform_0(%arg0: i32) -> (i32, i32) {
    %c0_i32 = arith.constant 0 : i32
    %c0_i32_0 = arith.constant 0 : i32
    return %arg0, %c0_i32 : i32, i32
  }
  func.func @transform_1(%arg0: i32) -> (i32, i32) {
    %c0_i32 = arith.constant 0 : i32
    %c0_i32_0 = arith.constant 0 : i32
    return %arg0, %c0_i32 : i32, i32
  }
}

</mosaic_0001>

<bundles_post_ra>
// kernel: tpu_custom_call.1
= control target key start
LH: loop header
LB: loop body
LE: loop exit
PB: predicated region body
PF: predicated region fallthrough
CT: control target
= control target key end

     0   :  { %6 = vsyncpa [#allocation3], 0  ;;  %s128_s0 = inlined_call_operand.hbm [shape: f32[1,512], index: 0, kind: input, shape index: {}]   ;;  %s129_s1 = inlined_call_operand.hbm [shape: f32[1,512], index: 1, kind: output, shape index: {}]  }
   0x1   :  { %7 = vsyncpa [#allocation4], 0  ;;  %s92_s6 = smov [#allocation2]   ;;  %s44_s10 = scalar_lea.hbm %s128_s0, 64 }
   0x2   :  { %s14_s7 = sshll.u32 %s92_s6, 4  ;;  %p45_p0 = scmp.ne.s32.totalorder %s128_s0, %s44_s10  ;;  %s15_s7 = int_to_ptr.vmem [resolvable:$true] %s14_s7 }
   0x3   :  { %p48_p1 = scmp.lt.u32.totalorder %s44_s10, %s128_s0 }
   0x5   :  { %p50_p2 = pnand %p48_p1, %p45_p0 }
   0x7   :  { %53 = shalt.err (!%p50_p2)
}
   0x8   :  { %s54_s15 = scalar_lea.vmem %s15_s7, 64  ;;  %p59_p4 = scmp.lt.s32.totalorder %s15_s7, %s15_s7 }
   0x9   :  { %p55_p3 = scmp.ne.s32.totalorder %s15_s7, %s54_s15  ;;  %p60_p5 = scmp.lt.s32.totalorder %s54_s15, %s54_s15 }
   0xb   :  { %p61_p6 = por %p60_p5, %p59_p4 }
   0xd   :  { %p62_p7 = pnand %p61_p6, %p55_p3 }
   0xf   :  { %65 = shalt.err (!%p62_p7)
}
  0x10   :  { %17 = dma.hbm_to_vmem [thread:$0]  %s128_s0, 64, %s15_s7, [#allocation3]  }
  0x11   :  { %88 = dma.done.wait [#allocation3], 64  }
  0x12   :  { %89 = vsyncadd [#allocation3], 4294967232  ;;  %v22_v0 = vlaneseq  ;;  %s93_s18 = smov [#allocation5]   ;;  %v21_v1 = vld [vmem:[#allocation2] sm:$0xf] }
  0x13   :  { %s33_s19 = sshll.u32 %s93_s18, 4  ;;  %s34_s19 = int_to_ptr.vmem [resolvable:$true] %s33_s19 }
  0x14   :  { %vm24_vm0 = vcmp.lt.s32.totalorder %v22_v0, 512  ;;  %s66_s20 = scalar_lea.vmem %s34_s19, 64  ;;  %p71_p9 = scmp.lt.s32.totalorder %s34_s19, %s34_s19 }
  0x15   :  { %26 = vst.msk [vmem:[#allocation5] sm:$0xf] %vm24_vm0, %v21_v1  ;;  %p67_p8 = scmp.ne.s32.totalorder %s34_s19, %s66_s20  ;;  %p72_p10 = scmp.lt.s32.totalorder %s66_s20, %s66_s20 }
  0x17   :  { %p73_p11 = por %p72_p10, %p71_p9 }
  0x19   :  { %p74_p12 = pnand %p73_p11, %p67_p8 }
  0x1b   :  { %77 = shalt.err (!%p74_p12)
}
  0x1c   :  { %s78_s0 = scalar_lea.hbm %s129_s1, 64 }
  0x1d   :  { %p79_p13 = scmp.ne.s32.totalorder %s129_s1, %s78_s0  ;;  %p82_p0 = scmp.lt.u32.totalorder %s78_s0, %s129_s1 }
  0x1f   :  { %p84_p1 = pnand %p82_p0, %p79_p13 }
  0x21   :  { %87 = shalt.err (!%p84_p1)
}
  0x22   :  { %36 = dma.vmem_to_hbm [thread:$0]  %s34_s19, 64, %s129_s1, [#allocation4]  }
  0x23   :  { %90 = dma.done.wait [#allocation4], 64  }
  0x24   :  { %91 = vsyncadd [#allocation4], 4294967232 }
  0x25   :  { %40 = vsyncpa [#allocation3], 1 }
  0x26   :  { %41 = vsyncpa [#allocation4], 1 }

</bundles_post_ra>
